<compile_context>
chip_gen: v5e
topology: v5e:2x2
jax: 0.10.0
libtpu: 0.0.40
codegen_flags: <defaults>
</compile_context>

<pallas_src>
import jax
import jax.numpy as jnp
from jax.experimental import pallas as pl
from jax.experimental.pallas import tpu as pltpu


def _round_up(x, m):
    return (x + m - 1) // m * m


def _pick_tn(out_features):
    """Pick an out_features tile: lane-dense (multiple of 128) divisor, else full."""
    for cand in (512, 256, 128):
        if out_features > cand and out_features % cand == 0:
            return cand
    return out_features


def _svd_linear_kernel(x_ref, bt_ref, at_ref, bias_ref, o_ref, t_ref):
    """Fused low-rank linear tile: Y = (x @ B^T) @ A^T + bias.

    x_ref:    (TM, in_features)        input tile (native dtype)
    bt_ref:   (in_features, rank_p)    B^T, rank zero-padded to multiple of 128
    at_ref:   (rank_p, TN)             A^T tile along out_features
    bias_ref: (1, TN)                  bias tile (f32)
    o_ref:    (TM, TN)                 output tile
    t_ref:    (TM, rank_p) f32 scratch cached intermediate x @ B^T
    """
    # Compute the low-rank intermediate once per M-tile (first N step) and
    # reuse it for every out_features tile j.
    @pl.when(pl.program_id(1) == 0)
    def _():
        t_ref[...] = jnp.dot(x_ref[...], bt_ref[...],
                             preferred_element_type=jnp.float32)

    y = jnp.dot(t_ref[...].astype(at_ref.dtype), at_ref[...],
                preferred_element_type=jnp.float32)
    o_ref[...] = (y + bias_ref[...]).astype(o_ref.dtype)


def svd_linear_forward(x, A, B, bias=None, *, tm=256, tn=None):
    """Pallas forward of SVDLinear.

    x:    (..., in_features)
    A:    (out_features, rank)   -- ALinear.weight
    B:    (rank, in_features)    -- BLinear.weight
    bias: (out_features,) or None
    """
    out_features, rank = A.shape
    rank_b, in_features = B.shape
    assert rank == rank_b and x.shape[-1] == in_features

    dtype = x.dtype

    # Pre-transpose the factors (no in-kernel .T) and zero-pad the rank
    # dimension to a lane-dense multiple of 128 (free math: zeros contribute 0).
    rank_p = _round_up(max(rank, 1), 128)
    Bt = jnp.zeros((in_features, rank_p), dtype).at[:, :rank].set(B.T.astype(dtype))
    At = jnp.zeros((rank_p, out_features), dtype).at[:rank, :].set(A.T.astype(dtype))

    if bias is None:
        bias_arr = jnp.zeros((1, out_features), jnp.float32)
    else:
        bias_arr = bias.reshape(1, out_features).astype(jnp.float32)

    lead_shape = x.shape[:-1]
    x2d = x.reshape(-1, in_features)
    M = x2d.shape[0]

    # M tile: large by default (MXU-friendly), shrunk for tiny inputs; pad the
    # tail instead of requiring tm | M.
    tm_eff = min(tm, _round_up(M, 8))
    M_pad = _round_up(M, tm_eff)
    if M_pad != M:
        x2d = jnp.pad(x2d, ((0, M_pad - M), (0, 0)))

    # out_features tile (keeps big layers VMEM-safe, e.g. on v7x).
    if tn is None:
        tn = _pick_tn(out_features)
    if out_features % tn != 0:
        tn = out_features

    grid = (M_pad // tm_eff, out_features // tn)

    flops = 2 * M_pad * rank_p * (in_features + out_features)
    bytes_accessed = (x2d.size * x2d.dtype.itemsize
                      + Bt.size * Bt.dtype.itemsize
                      + At.size * At.dtype.itemsize
                      + bias_arr.size * 4
                      + M_pad * out_features * x.dtype.itemsize)

    out2d = pl.pallas_call(
        _svd_linear_kernel,
        out_shape=jax.ShapeDtypeStruct((M_pad, out_features), x.dtype),
        grid_spec=pltpu.PrefetchScalarGridSpec(
            num_scalar_prefetch=0,
            grid=grid,
            in_specs=[
                pl.BlockSpec((tm_eff, in_features), lambda i, j: (i, 0)),  # x tile
                pl.BlockSpec((in_features, rank_p), lambda i, j: (0, 0)),  # B^T (resident)
                pl.BlockSpec((rank_p, tn), lambda i, j: (0, j)),           # A^T tile
                pl.BlockSpec((1, tn), lambda i, j: (0, j)),                # bias tile
            ],
            out_specs=pl.BlockSpec((tm_eff, tn), lambda i, j: (i, j)),
            scratch_shapes=[pltpu.VMEM((tm_eff, rank_p), jnp.float32)],
        ),
        compiler_params=pltpu.CompilerParams(
            dimension_semantics=("parallel", "arbitrary")),
        cost_estimate=pl.CostEstimate(
            flops=flops, transcendentals=0, bytes_accessed=bytes_accessed),
    )(x2d, Bt, At, bias_arr)

    out2d = out2d[:M]
    return out2d.reshape(*lead_shape, out_features)


def svd_linear_reference(x, A, B, bias=None):
    """Pure-JAX reference mirroring the PyTorch SVDLinear forward."""
    y = (x @ B.T) @ A.T
    if bias is not None:
        y = y + bias
    return y


if __name__ == "__main__":
    # Small, module-consistent shapes.
    batch, seq = 2, 8
    in_features, out_features, rank = 32, 32, 16

    key = jax.random.PRNGKey(0)
    kx, kA, kB, kbias = jax.random.split(key, 4)

    x = jax.random.normal(kx, (batch, seq, in_features), dtype=jnp.float32)
    A = jax.random.normal(kA, (out_features, rank), dtype=jnp.float32) * 0.1
    B = jax.random.normal(kB, (rank, in_features), dtype=jnp.float32) * 0.1
    bias = jax.random.normal(kbias, (out_features,), dtype=jnp.float32) * 0.01

    y = svd_linear_forward(x, A, B, bias)
    y = jax.block_until_ready(y)

    y_ref = svd_linear_reference(x, A, B, bias)
    assert y.shape == (batch, seq, out_features)
    assert jnp.allclose(y, y_ref, atol=1e-5, rtol=1e-5), "mismatch vs reference"

    print("KERNEL_OK")
</pallas_src>

<mosaic_0001>
module attributes {stable_mosaic.version = 11 : i64} {
  func.func @_svd_linear_kernel(%arg0: i32, %arg1: i32, %arg2: memref<16x32xf32, #tpu.memory_space<vmem>>, %arg3: memref<32x128xf32, #tpu.memory_space<vmem>>, %arg4: memref<128x32xf32, #tpu.memory_space<vmem>>, %arg5: memref<1x32xf32, #tpu.memory_space<vmem>>, %arg6: memref<16x32xf32, #tpu.memory_space<vmem>>, %arg7: memref<16x128xf32, #tpu.memory_space<vmem>>) attributes {dimension_semantics = [#tpu.dimension_semantics<parallel>, #tpu.dimension_semantics<arbitrary>], iteration_bounds = array<i64: 1, 1>, scalar_prefetch = 0 : i64, scratch_operands = 1 : i64, tpu.core_type = #tpu.core_type<tc>, window_params = [{transform_indices = @transform_0, window_bounds = array<i64: 16, 32>}, {pipeline_mode = #tpu.pipeline_mode<synchronous>, transform_indices = @transform_1, window_bounds = array<i64: 32, 128>}, {transform_indices = @transform_2, window_bounds = array<i64: 128, 32>}, {transform_indices = @transform_3, window_bounds = array<i64: 1, 32>}, {transform_indices = @transform_4, window_bounds = array<i64: 16, 32>}]} {
    %c0_i32 = arith.constant 0 : i32
    %0 = arith.cmpi eq, %arg1, %c0_i32 : i32
    %1 = arith.extui %0 : i1 to i32
    %c0_i32_0 = arith.constant 0 : i32
    %2 = arith.cmpi ne, %1, %c0_i32_0 : i32
    scf.if %2 {
      %c0_8 = arith.constant 0 : index
      %c0_9 = arith.constant 0 : index
      %10 = vector.load %arg2[%c0_8, %c0_9] : memref<16x32xf32, #tpu.memory_space<vmem>>, vector<16x32xf32>
      %c0_10 = arith.constant 0 : index
      %c0_11 = arith.constant 0 : index
      %11 = vector.load %arg3[%c0_10, %c0_11] : memref<32x128xf32, #tpu.memory_space<vmem>>, vector<32x128xf32>
      %cst_12 = arith.constant dense<0.000000e+00> : vector<16x128xf32>
      %12 = tpu.matmul %10, %11, %cst_12 {dimension_numbers = #tpu.dot_dimension_numbers<[1], [0], [0], [1], [0, 0, 1, 1], [], []>} : vector<16x32xf32>, vector<32x128xf32>, vector<16x128xf32> -> vector<16x128xf32>
      %c0_13 = arith.constant 0 : index
      %c0_14 = arith.constant 0 : index
      %13 = vector.load %arg7[%c0_13, %c0_14] : memref<16x128xf32, #tpu.memory_space<vmem>>, vector<16x128xf32>
      tpu.vector_store %arg7[%c0_13, %c0_14], %12 {strides = array<i32>} : memref<16x128xf32, #tpu.memory_space<vmem>>, vector<16x128xf32>,
    } else {
    }
    %c0 = arith.constant 0 : index
    %c0_1 = arith.constant 0 : index
    %3 = vector.load %arg7[%c0, %c0_1] : memref<16x128xf32, #tpu.memory_space<vmem>>, vector<16x128xf32>
    %c0_2 = arith.constant 0 : index
    %c0_3 = arith.constant 0 : index
    %4 = vector.load %arg4[%c0_2, %c0_3] : memref<128x32xf32, #tpu.memory_space<vmem>>, vector<128x32xf32>
    %cst = arith.constant dense<0.000000e+00> : vector<16x32xf32>
    %5 = tpu.matmul %3, %4, %cst {dimension_numbers = #tpu.dot_dimension_numbers<[1], [0], [0], [1], [0, 0, 1, 1], [], []>} : vector<16x128xf32>, vector<128x32xf32>, vector<16x32xf32> -> vector<16x32xf32>
    %c0_4 = arith.constant 0 : index
    %c0_5 = arith.constant 0 : index
    %6 = vector.load %arg5[%c0_4, %c0_5] : memref<1x32xf32, #tpu.memory_space<vmem>>, vector<1x32xf32>
    %7 = vector.broadcast %6 : vector<1x32xf32> to vector<16x32xf32>
    %8 = arith.addf %5, %7 : vector<16x32xf32>
    %c0_6 = arith.constant 0 : index
    %c0_7 = arith.constant 0 : index
    %9 = vector.load %arg6[%c0_6, %c0_7] : memref<16x32xf32, #tpu.memory_space<vmem>>, vector<16x32xf32>
    tpu.vector_store %arg6[%c0_6, %c0_7], %8 {strides = array<i32>} : memref<16x32xf32, #tpu.memory_space<vmem>>, vector<16x32xf32>,
    return
  }
  func.func @transform_0(%arg0: i32, %arg1: i32) -> (i32, i32) {
    %c0_i32 = arith.constant 0 : i32
    %c0_i32_0 = arith.constant 0 : i32
    return %arg0, %c0_i32 : i32, i32
  }
  func.func @transform_1(%arg0: i32, %arg1: i32) -> (i32, i32) {
    %c0_i32 = arith.constant 0 : i32
    %c0_i32_0 = arith.constant 0 : i32
    %c0_i32_1 = arith.constant 0 : i32
    return %c0_i32, %c0_i32_0 : i32, i32
  }
  func.func @transform_2(%arg0: i32, %arg1: i32) -> (i32, i32) {
    %c0_i32 = arith.constant 0 : i32
    %c0_i32_0 = arith.constant 0 : i32
    return %c0_i32, %arg1 : i32, i32
  }
  func.func @transform_3(%arg0: i32, %arg1: i32) -> (i32, i32) {
    %c0_i32 = arith.constant 0 : i32
    %c0_i32_0 = arith.constant 0 : i32
    return %c0_i32, %arg1 : i32, i32
  }
  func.func @transform_4(%arg0: i32, %arg1: i32) -> (i32, i32) {
    %c0_i32 = arith.constant 0 : i32
    return %arg0, %arg1 : i32, i32
  }
}

</mosaic_0001>

<bundles_post_ra>
// kernel: tpu_custom_call.1
= control target key start
LH: loop header
LB: loop body
LE: loop exit
PB: predicated region body
PF: predicated region fallthrough
CT: control target
= control target key end

     0   :  { %vm28_vm0 = vcmask 261120   ;;  %s278_s0 = inlined_call_operand.vmem [shape: f32[16,32], index: 0, kind: input, shape index: {}]   ;;  %s279_s1 = inlined_call_operand.vmem [shape: f32[32,128], index: 1, kind: input, shape index: {}]   ;;  %s280_s2 = inlined_call_operand.vmem [shape: f32[128,32], index: 2, kind: input, shape index: {}]   ;;  %s281_s3 = inlined_call_operand.vmem [shape: f32[1,32], index: 3, kind: input, shape index: {}]   ;;  %s282_s4 = inlined_call_operand.hbm [shape: f32[16,32], index: 4, kind: output, shape index: {}]  }
   0x1   :  { %v27_v0 = vld [vmem:[%s279_s1 + $0x18] sm:$0xff]  ;;  %v26_v1 = vld [vmem:[%s279_s1 + $0x10] sm:$0xff]  ;;  %v25_v2 = vld [vmem:[%s279_s1 + $0x8] sm:$0xff] }
   0x2   :  { %47 = vmatpush.msra.mxu0 %v27_v0  ;;  %v77_v3 = vld [vmem:[%s280_s2 + $0x78] sm:$0xff]  ;;  %v76_v4 = vld [vmem:[%s280_s2 + $0x70] sm:$0xff]  ;;  %v24_v5 = vld [vmem:[%s279_s1] sm:$0xff] }
   0x3   :  { %82 = vmatpush.msra.mxu1 %v77_v3  ;;  %v75_v6 = vld [vmem:[%s280_s2 + $0x68] sm:$0xff]  ;;  %128 = vmatpush.msra.mxu2 %v77_v3  ;;  %v22_v7 = vld [vmem:[%s278_s0] sm:$0xff] }
   0x4   :  { %48 = vmatpush.msra.mxu0 %v26_v1  ;;  %v74_v8 = vld [vmem:[%s280_s2 + $0x60] sm:$0xff] }
   0x5   :  { %83 = vmatpush.msra.mxu1 %v76_v4  ;;  %129 = vmatpush.msra.mxu2 %v76_v4 }
   0x6   :  { %49 = vmatpush.msra.mxu0 %v25_v2 }
   0x7   :  { %84 = vmatpush.msra.mxu1 %v75_v6 }
   0x8   :  { %50 = vmatpush.msra.mxu0 %v24_v5 }
   0x9   :  { %9 = vsyncpa [#allocation4], 0  ;;  %126 = vmatmul.msk.f32.vlgmr.msra.gmra.mxu0 %vm28_vm0, %v22_v7  ;;  %v73_v9 = vld [vmem:[%s280_s2 + $0x58] sm:$0xff]  ;;  %130 = vmatpush.msra.mxu2 %v75_v6  ;;  %v72_v10 = vld [vmem:[%s280_s2 + $0x50] sm:$0xff]  ;;  %s174_s1 = smov [#allocation3]   ;;  %s175_s10 = smov 128  }
   0xa   :  { %85 = vmatpush.msra.mxu1 %v74_v8  ;;  %v71_v11 = vld [vmem:[%s280_s2 + $0x48] sm:$0xff]  ;;  %v70_v13 = vld [vmem:[%s280_s2 + $0x40] sm:$0xff]  ;;  %v69_v14 = vld [vmem:[%s280_s2 + $0x38] sm:$0xff]  ;;  %s112_s7 = sshll.u32 %s174_s1, 4  ;;  %s176_s11 = smov 8   ;;  %s113_s7 = int_to_ptr.vmem [resolvable:$true] %s112_s7 }
   0xb   :  { %131 = vmatpush.msra.mxu2 %v74_v8  ;;  %v23_v12 = vld [vmem:[%s278_s0 + $0x8] sm:$0xff]  ;;  %v68_v15 = vld [vmem:[%s280_s2 + $0x30] sm:$0xff]  ;;  %v66_v17 = vld [vmem:[%s280_s2 + $0x20] sm:$0xff] }
   0xc   :  { %86 = vmatpush.msra.mxu1 %v73_v9  ;;  %v67_v16 = vld [vmem:[%s280_s2 + $0x28] sm:$0xff]  ;;  %v65_v18 = vld [vmem:[%s280_s2 + $0x18] sm:$0xff]  ;;  %v64_v19 = vld [vmem:[%s280_s2 + $0x10] sm:$0xff] }
   0xd   :  { %132 = vmatpush.msra.mxu2 %v73_v9  ;;  %v63_v20 = vld [vmem:[%s280_s2 + $0x8] sm:$0xff]  ;;  %v62_v21 = vld [vmem:[%s280_s2] sm:$0xff]  ;;  %s114_s2 = sshll.u32 %s282_s4, 4  ;;  %s115_s2 = int_to_ptr.hbm [resolvable:$true] %s114_s2 }
   0xe   :  { %87 = vmatpush.msra.mxu1 %v72_v10  ;;  %v147_v24 = vld [vmem:[%s281_s3] ss:$0 sm:$0xff] }
   0xf   :  { %133 = vmatpush.msra.mxu2 %v72_v10 }
  0x10   :  { %88 = vmatpush.msra.mxu1 %v71_v11 }
  0x11   :  { %127 = vmatmul.msk.f32.gmra.mxu0 %vm28_vm0, %v23_v12  ;;  %134 = vmatpush.msra.mxu2 %v71_v11 }
  0x12   :  { %89 = vmatpush.msra.mxu1 %v70_v13 }
  0x13   :  { %135 = vmatpush.msra.mxu2 %v70_v13 }
  0x14   :  { %90 = vmatpush.msra.mxu1 %v69_v14 }
  0x15   :  { %136 = vmatpush.msra.mxu2 %v69_v14 }
  0x16   :  { %91 = vmatpush.msra.mxu1 %v68_v15 }
  0x17   :  { %137 = vmatpush.msra.mxu2 %v68_v15 }
  0x18   :  { %92 = vmatpush.msra.mxu1 %v67_v16 }
  0x19   :  { %138 = vmatpush.msra.mxu2 %v67_v16 }
  0x1a   :  { %93 = vmatpush.msra.mxu1 %v66_v17 }
  0x1b   :  { %139 = vmatpush.msra.mxu2 %v66_v17 }
  0x1c   :  { %94 = vmatpush.msra.mxu1 %v65_v18 }
  0x1d   :  { %140 = vmatpush.msra.mxu2 %v65_v18 }
  0x1e   :  { %95 = vmatpush.msra.mxu1 %v64_v19 }
  0x1f   :  { %141 = vmatpush.msra.mxu2 %v64_v19 }
  0x20   :  { %96 = vmatpush.msra.mxu1 %v63_v20 }
  0x21   :  { %142 = vmatpush.msra.mxu2 %v63_v20 }
  0x22   :  { %97 = vmatpush.msra.mxu1 %v62_v21 }
  0x23   :  { %143 = vmatpush.msra.mxu2 %v62_v21 }
  0x86   :  { %v52_v22 = vpop.f32.mrf.mxu0 }
  0x87   :  { %98 = vmatmul.f32.vlgmr.msra.gmra.mxu1 %v52_v22 }
  0x8e   :  { %v55_v23 = vpop.f32.mrf.mxu0 }
  0x8f   :  { %101 = vmatmul.f32.vlgmr.msra.gmra.mxu2 %v55_v23 }
 0x104   :  { %v99_v25 = vpop.f32.mrf.mxu1 }
 0x105   :  { %v100_v26 = vadd.f32 %v147_v24, %v99_v25 }
 0x107   :  { %106 = vst.msk [vmem:[#allocation3] sm:$0xff] %vm28_vm0, %v100_v26 }
 0x112   :  { %v102_v27 = vpop.f32.mrf.mxu2 }
 0x113   :  { %v103_v28 = vadd.f32 %v147_v24, %v102_v27 }
 0x115   :  { %107 = vst.msk [vmem:[#allocation3 + $0x8] sm:$0xff] %vm28_vm0, %v103_v28 }
 0x116   :  { %120 = dma.vmem_to_hbm [thread:$0]  %s113_s7, 256, %s115_s2, [#allocation4], %s175_s10, %s175_s10, %s176_s11  }
 0x117   :  { %172 = dma.done.wait [#allocation4], 256  }
 0x118   :  { %173 = vsyncadd [#allocation4], 4294967040 }
 0x119   :  { %125 = vsyncpa [#allocation4], 1 }

</bundles_post_ra>
